<compile_context>
chip_gen: v6e
topology: v6e:2x2x1
jax: 0.10.0
libtpu: 0.0.40
codegen_flags: <defaults>
</compile_context>

<pallas_src>
import functools

import jax
import jax.numpy as jnp
from jax import lax
from jax.experimental import pallas as pl
from jax.experimental.pallas import tpu as pltpu


# --------------------------------------------------------------------------- #
# helpers
# --------------------------------------------------------------------------- #
def _pick_tile(dim: int, preferred: int) -> int:
    """Use the big MXU-friendly tile when it divides the dim, else the full dim."""
    return preferred if dim % preferred == 0 else dim


def precompute_freqs_cis(dim: int, end: int, theta: float = 10000.0):
    freqs = 1.0 / (theta ** (jnp.arange(0, dim, 2)[: dim // 2].astype(jnp.float32) / dim))
    t = jnp.arange(end, dtype=jnp.float32)
    freqs = jnp.outer(t, freqs)                      # (end, dim//2)
    return jnp.cos(freqs), jnp.sin(freqs)


def apply_rotary_emb(xq, xk, cos, sin):
    # TODO(synk): rotary is cheap memory-bound elementwise glue; kept in plain JAX rather
    # than a dedicated Pallas kernel (interleaved-pair lane shuffle adds risk, no FLOP win).
    def rot(x):
        S, H, D = x.shape
        xr = x.reshape(S, H, D // 2, 2)
        x_re, x_im = xr[..., 0], xr[..., 1]
        c = cos[:, None, :]
        s = sin[:, None, :]
        o_re = x_re * c - x_im * s
        o_im = x_re * s + x_im * c
        return jnp.stack([o_re, o_im], axis=-1).reshape(S, H, D)

    return rot(xq), rot(xk)


# --------------------------------------------------------------------------- #
# tiled matmul kernel (used for fused QKV projection and output projection)
# --------------------------------------------------------------------------- #
def _matmul_kernel(a_ref, b_ref, o_ref, acc_ref):
    @pl.when(pl.program_id(2) == 0)
    def _():
        acc_ref[...] = jnp.zeros_like(acc_ref)

    acc_ref[...] += jnp.dot(a_ref[...], b_ref[...],
                            preferred_element_type=jnp.float32)

    @pl.when(pl.program_id(2) == pl.num_programs(2) - 1)
    def _():
        o_ref[...] = acc_ref[...].astype(o_ref.dtype)


def pallas_matmul(a, b, *, tm=256, tn=256, tk=512, out_dtype=None):
    M, K = a.shape
    K2, N = b.shape
    assert K == K2
    out_dtype = out_dtype or a.dtype
    tm = _pick_tile(M, tm)
    tn = _pick_tile(N, tn)
    tk = _pick_tile(K, tk)

    flops = 2 * M * N * K
    bytes_accessed = int(a.size * a.dtype.itemsize + b.size * b.dtype.itemsize
                         + M * N * jnp.dtype(out_dtype).itemsize)

    return pl.pallas_call(
        _matmul_kernel,
        out_shape=jax.ShapeDtypeStruct((M, N), out_dtype),
        grid_spec=pltpu.PrefetchScalarGridSpec(
            num_scalar_prefetch=0,
            grid=(M // tm, N // tn, K // tk),
            in_specs=[
                pl.BlockSpec((tm, tk), lambda i, j, k: (i, k)),
                pl.BlockSpec((tk, tn), lambda i, j, k: (k, j)),
            ],
            out_specs=pl.BlockSpec((tm, tn), lambda i, j, k: (i, j)),
            scratch_shapes=[pltpu.VMEM((tm, tn), jnp.float32)],
        ),
        compiler_params=pltpu.CompilerParams(
            dimension_semantics=("parallel", "parallel", "arbitrary")),
        cost_estimate=pl.CostEstimate(flops=flops, transcendentals=0,
                                      bytes_accessed=bytes_accessed),
    )(a, b)


# --------------------------------------------------------------------------- #
# flash attention kernel (causal, GQA via index_map, online softmax)
# --------------------------------------------------------------------------- #
def _flash_attn_kernel(q_ref, k_ref, v_ref, o_ref, m_scr, l_scr, acc_scr, *, scale):
    qi = pl.program_id(1)
    ki = pl.program_id(2)
    tq = q_ref.shape[0]
    tkv = k_ref.shape[0]

    @pl.when(ki == 0)
    def _():
        m_scr[...] = jnp.full(m_scr.shape, -jnp.inf, jnp.float32)
        l_scr[...] = jnp.zeros(l_scr.shape, jnp.float32)
        acc_scr[...] = jnp.zeros(acc_scr.shape, jnp.float32)

    # Skip kv tiles strictly above the causal diagonal (pure win, accumulators untouched).
    @pl.when(ki * tkv <= qi * tq + (tq - 1))
    def _():
        s = lax.dot_general(q_ref[...], k_ref[...],
                            dimension_numbers=(((1,), (1,)), ((), ())),
                            preferred_element_type=jnp.float32) * scale      # (tq, tkv)
        q_idx = qi * tq + lax.broadcasted_iota(jnp.int32, (tq, tkv), 0)
        k_idx = ki * tkv + lax.broadcasted_iota(jnp.int32, (tq, tkv), 1)
        s = jnp.where(k_idx <= q_idx, s, -jnp.inf)

        m_prev = m_scr[...]
        m_new = jnp.maximum(m_prev, s.max(axis=-1, keepdims=True))
        alpha = jnp.exp(m_prev - m_new)
        p = jnp.exp(s - m_new)
        l_scr[...] = alpha * l_scr[...] + p.sum(axis=-1, keepdims=True)
        acc_scr[...] = alpha * acc_scr[...] + jnp.dot(
            p.astype(v_ref.dtype), v_ref[...], preferred_element_type=jnp.float32)
        m_scr[...] = m_new

    @pl.when(ki == pl.num_programs(2) - 1)
    def _():
        o_ref[...] = (acc_scr[...] * pl.reciprocal(l_scr[...])).astype(o_ref.dtype)


def pallas_flash_attention(q, k, v, *, repeats, scale, tq=256, tkv=256):
    """q: (Hq, S, Dh); k, v: (Hkv, S, Dh) with Hq = Hkv * repeats. Causal mask."""
    Hq, S, Dh = q.shape
    Hkv = k.shape[0]
    assert Hq == Hkv * repeats
    tq = _pick_tile(S, tq)
    tkv = _pick_tile(S, tkv)

    flops = 4 * Hq * S * S * Dh
    bytes_accessed = int((q.size + k.size + v.size + q.size) * q.dtype.itemsize)

    kernel = functools.partial(_flash_attn_kernel, scale=scale)
    return pl.pallas_call(
        kernel,
        out_shape=jax.ShapeDtypeStruct((Hq, S, Dh), q.dtype),
        grid_spec=pltpu.PrefetchScalarGridSpec(
            num_scalar_prefetch=0,
            grid=(Hq, S // tq, S // tkv),
            in_specs=[
                pl.BlockSpec((None, tq, Dh), lambda h, i, j: (h, i, 0)),
                # GQA: each query head reads its shared kv head — no repeat_kv materialization.
                pl.BlockSpec((None, tkv, Dh), lambda h, i, j: (h // repeats, j, 0)),
                pl.BlockSpec((None, tkv, Dh), lambda h, i, j: (h // repeats, j, 0)),
            ],
            out_specs=pl.BlockSpec((None, tq, Dh), lambda h, i, j: (h, i, 0)),
            scratch_shapes=[
                pltpu.VMEM((tq, 1), jnp.float32),    # running max
                pltpu.VMEM((tq, 1), jnp.float32),    # running denom
                pltpu.VMEM((tq, Dh), jnp.float32),   # f32 accumulator
            ],
        ),
        compiler_params=pltpu.CompilerParams(
            dimension_semantics=("parallel", "parallel", "arbitrary")),
        cost_estimate=pl.CostEstimate(flops=flops, transcendentals=Hq * S * S,
                                      bytes_accessed=bytes_accessed),
    )(q, k, v)


# --------------------------------------------------------------------------- #
# Attention forward (matches the PyTorch module's forward semantics, causal mask)
# --------------------------------------------------------------------------- #
def prepare_params(wq, wk, wv, wo):
    """Hoisted out of the forward: fuse q/k/v weights and pre-transpose to (in, out)."""
    wqkv_t = jnp.concatenate([wq, wk, wv], axis=0).T    # (D, Hq + 2*Hkv)
    wo_t = wo.T                                         # (Hq, D)
    return wqkv_t, wo_t


def attention_forward(x, params, cos, sin, *, n_heads, n_kv_heads, head_dim):
    S, D = x.shape
    repeats = n_heads // n_kv_heads
    hq = n_heads * head_dim
    hkv = n_kv_heads * head_dim
    wqkv_t, wo_t = params

    qkv = pallas_matmul(x, wqkv_t)                       # (S, Hq + 2*Hkv) — one fused MXU matmul
    xq = qkv[:, :hq].reshape(S, n_heads, head_dim)
    xk = qkv[:, hq:hq + hkv].reshape(S, n_kv_heads, head_dim)
    xv = qkv[:, hq + hkv:].reshape(S, n_kv_heads, head_dim)

    xq, xk = apply_rotary_emb(xq, xk, cos, sin)

    q = xq.transpose(1, 0, 2)                            # (Hq,  S, Dh)
    k = xk.transpose(1, 0, 2)                            # (Hkv, S, Dh)
    v = xv.transpose(1, 0, 2)                            # (Hkv, S, Dh)

    o = pallas_flash_attention(q, k, v, repeats=repeats, scale=head_dim ** -0.5)
    o = o.transpose(1, 0, 2).reshape(S, hq)

    return pallas_matmul(o, wo_t)                        # (S, D)


# --------------------------------------------------------------------------- #
# pure-JAX reference for the assertion
# --------------------------------------------------------------------------- #
def _reference(x, wq, wk, wv, wo, cos, sin, n_heads, n_kv_heads, head_dim):
    S, _ = x.shape
    xq = (x @ wq.T).reshape(S, n_heads, head_dim)
    xk = (x @ wk.T).reshape(S, n_kv_heads, head_dim)
    xv = (x @ wv.T).reshape(S, n_kv_heads, head_dim)
    xq, xk = apply_rotary_emb(xq, xk, cos, sin)
    repeats = n_heads // n_kv_heads
    key = jnp.repeat(xk, repeats, axis=1)                # repeat_kv
    val = jnp.repeat(xv, repeats, axis=1)
    q = xq.transpose(1, 0, 2)
    k = key.transpose(1, 0, 2)
    v = val.transpose(1, 0, 2)
    scores = jnp.einsum("hqd,hkd->hqk", q, k) * (head_dim ** -0.5)
    causal = jnp.tril(jnp.ones((S, S), dtype=bool))
    scores = jnp.where(causal[None], scores, -jnp.inf)
    p = jax.nn.softmax(scores, axis=-1)
    out = jnp.einsum("hqk,hkd->hqd", p, v)
    out = out.transpose(1, 0, 2).reshape(S, n_heads * head_dim)
    return out @ wo.T


if __name__ == "__main__":
    # Small, module-consistent shapes: seqlen_sum=16, dim=64, 4 query heads / 2 kv heads, head_dim=16.
    seqlen_sum, dim = 16, 64
    n_heads, n_kv_heads, head_dim = 4, 2, 16

    key = jax.random.PRNGKey(0)
    kx, kq, kk, kv_, ko = jax.random.split(key, 5)

    def init(k, shape, fan_in):
        return jax.random.uniform(k, shape, jnp.float32,
                                  minval=-1.0, maxval=1.0) / jnp.sqrt(fan_in)

    x = jax.random.normal(kx, (seqlen_sum, dim), dtype=jnp.float32)
    wq = init(kq, (n_heads * head_dim, dim), dim)        # nn.Linear layout (out, in), bias=False
    wk = init(kk, (n_kv_heads * head_dim, dim), dim)
    wv = init(kv_, (n_kv_heads * head_dim, dim), dim)
    wo = init(ko, (dim, n_heads * head_dim), n_heads * head_dim)

    cos, sin = precompute_freqs_cis(head_dim, seqlen_sum)
    params = prepare_params(wq, wk, wv, wo)              # fused + transposed once, not per call

    out = attention_forward(x, params, cos, sin,
                            n_heads=n_heads, n_kv_heads=n_kv_heads, head_dim=head_dim)
    out = jax.block_until_ready(out)

    ref = _reference(x, wq, wk, wv, wo, cos, sin, n_heads, n_kv_heads, head_dim)
    assert out.shape == ref.shape == (seqlen_sum, dim)
    assert jnp.allclose(out, ref, atol=1e-4, rtol=1e-4), "mismatch vs reference"
    print("KERNEL_OK")
</pallas_src>

<mosaic_0001>
module attributes {stable_mosaic.version = 11 : i64} {
  func.func @_matmul_kernel(%arg0: i32, %arg1: i32, %arg2: i32, %arg3: memref<16x64xf32, #tpu.memory_space<vmem>>, %arg4: memref<64x128xf32, #tpu.memory_space<vmem>>, %arg5: memref<16x128xf32, #tpu.memory_space<vmem>>, %arg6: memref<16x128xf32, #tpu.memory_space<vmem>>) attributes {dimension_semantics = [#tpu.dimension_semantics<parallel>, #tpu.dimension_semantics<parallel>, #tpu.dimension_semantics<arbitrary>], iteration_bounds = array<i64: 1, 1, 1>, scalar_prefetch = 0 : i64, scratch_operands = 1 : i64, tpu.core_type = #tpu.core_type<tc>, window_params = [{transform_indices = @transform_0, window_bounds = array<i64: 16, 64>}, {transform_indices = @transform_1, window_bounds = array<i64: 64, 128>}, {transform_indices = @transform_2, window_bounds = array<i64: 16, 128>}]} {
    %c0_i32 = arith.constant 0 : i32
    %0 = arith.cmpi eq, %arg2, %c0_i32 : i32
    %1 = arith.extui %0 : i1 to i32
    %c0_i32_0 = arith.constant 0 : i32
    %2 = arith.cmpi ne, %1, %c0_i32_0 : i32
    scf.if %2 {
      %cst_10 = arith.constant 0.000000e+00 : f32
      %12 = vector.broadcast %cst_10 : f32 to vector<16x128xf32>
      %c0_11 = arith.constant 0 : index
      %c0_12 = arith.constant 0 : index
      %13 = vector.load %arg6[%c0_11, %c0_12] : memref<16x128xf32, #tpu.memory_space<vmem>>, vector<16x128xf32>
      tpu.vector_store %arg6[%c0_11, %c0_12], %12 {strides = array<i32>} : memref<16x128xf32, #tpu.memory_space<vmem>>, vector<16x128xf32>,
    } else {
    }
    %c0 = arith.constant 0 : index
    %c0_1 = arith.constant 0 : index
    %3 = vector.load %arg6[%c0, %c0_1] : memref<16x128xf32, #tpu.memory_space<vmem>>, vector<16x128xf32>
    %c0_2 = arith.constant 0 : index
    %c0_3 = arith.constant 0 : index
    %4 = vector.load %arg3[%c0_2, %c0_3] : memref<16x64xf32, #tpu.memory_space<vmem>>, vector<16x64xf32>
    %c0_4 = arith.constant 0 : index
    %c0_5 = arith.constant 0 : index
    %5 = vector.load %arg4[%c0_4, %c0_5] : memref<64x128xf32, #tpu.memory_space<vmem>>, vector<64x128xf32>
    %cst = arith.constant dense<0.000000e+00> : vector<16x128xf32>
    %6 = tpu.matmul %4, %5, %cst {dimension_numbers = #tpu.dot_dimension_numbers<[1], [0], [0], [1], [0, 0, 1, 1], [], []>} : vector<16x64xf32>, vector<64x128xf32>, vector<16x128xf32> -> vector<16x128xf32>
    %7 = arith.addf %3, %6 : vector<16x128xf32>
    %c0_6 = arith.constant 0 : index
    %c0_7 = arith.constant 0 : index
    %8 = vector.load %arg6[%c0_6, %c0_7] : memref<16x128xf32, #tpu.memory_space<vmem>>, vector<16x128xf32>
    tpu.vector_store %arg6[%c0_6, %c0_7], %7 {strides = array<i32>} : memref<16x128xf32, #tpu.memory_space<vmem>>, vector<16x128xf32>,
    %c0_i32_8 = arith.constant 0 : i32
    %9 = arith.cmpi eq, %arg2, %c0_i32_8 : i32
    %10 = arith.extui %9 : i1 to i32
    %c0_i32_9 = arith.constant 0 : i32
    %11 = arith.cmpi ne, %10, %c0_i32_9 : i32
    scf.if %11 {
      %c0_10 = arith.constant 0 : index
      %c0_11 = arith.constant 0 : index
      %12 = vector.load %arg6[%c0_10, %c0_11] : memref<16x128xf32, #tpu.memory_space<vmem>>, vector<16x128xf32>
      %c0_12 = arith.constant 0 : index
      %c0_13 = arith.constant 0 : index
      %13 = vector.load %arg5[%c0_12, %c0_13] : memref<16x128xf32, #tpu.memory_space<vmem>>, vector<16x128xf32>
      tpu.vector_store %arg5[%c0_12, %c0_13], %12 {strides = array<i32>} : memref<16x128xf32, #tpu.memory_space<vmem>>, vector<16x128xf32>,
    } else {
    }
    return
  }
  func.func @transform_0(%arg0: i32, %arg1: i32, %arg2: i32) -> (i32, i32) {
    %c0_i32 = arith.constant 0 : i32
    return %arg0, %arg2 : i32, i32
  }
  func.func @transform_1(%arg0: i32, %arg1: i32, %arg2: i32) -> (i32, i32) {
    %c0_i32 = arith.constant 0 : i32
    return %arg2, %arg1 : i32, i32
  }
  func.func @transform_2(%arg0: i32, %arg1: i32, %arg2: i32) -> (i32, i32) {
    %c0_i32 = arith.constant 0 : i32
    return %arg0, %arg1 : i32, i32
  }
}

</mosaic_0001>

<bundles_post_ra>
// kernel: tpu_custom_call.1
= control target key start
LH: loop header
LB: loop body
LE: loop exit
PB: predicated region body
PF: predicated region fallthrough
CT: control target
= control target key end

     0   :  { %7 = vsyncpa [#allocation4], 0  ;;  %s311_s0 = inlined_call_operand.hbm [shape: f32[16,64], index: 0, kind: input, shape index: {}]   ;;  %s312_s1 = inlined_call_operand.hbm [shape: f32[64,128], index: 1, kind: input, shape index: {}]   ;;  %s313_s2 = inlined_call_operand.hbm [shape: f32[16,128], index: 2, kind: output, shape index: {}]  }
   0x1   :  { %8 = vsyncpa [#allocation7], 0 }
   0x2   :  { %9 = vsyncpa [#allocation5], 0  ;;  %s271_s9 = smov [#allocation3]  }
   0x3   :  { %s15_s10 = sshll.u32 %s271_s9, 4  ;;  %s16_s10 = int_to_ptr.vmem [resolvable:$true] %s15_s10 }
   0x4   :  { %s213_s11 = scalar_lea.vmem %s16_s10, 256  ;;  %p218_p1 = scmp.lt.s32.totalorder %s16_s10, %s16_s10 }
   0x5   :  { %p214_p0 = scmp.ne.s32.totalorder %s16_s10, %s213_s11  ;;  %p219_p2 = scmp.lt.s32.totalorder %s213_s11, %s213_s11 }
   0x7   :  { %p220_p3 = por %p219_p2, %p218_p1 }
   0x9   :  { %p221_p4 = pnand %p220_p3, %p214_p0 }
   0xb   :  { %224 = shalt.err (!%p221_p4)
}
   0xc   :  { %s272_s12 = smov 128   ;;  %s273_s13 = smov 8  }
   0xd   :  { %21 = dma.hbm_to_vmem [thread:$0]  %s311_s0, 256, %s16_s10, [#allocation4], %s272_s12, %s272_s12, %s273_s13  }
   0xe   :  { %s274_s16 = smov [#allocation6]  }
   0xf   :  { %s27_s17 = sshll.u32 %s274_s16, 4  ;;  %s28_s17 = int_to_ptr.vmem [resolvable:$true] %s27_s17 }
  0x10   :  { %s233_s18 = scalar_lea.vmem %s28_s17, 1024  ;;  %p238_p6 = scmp.lt.s32.totalorder %s28_s17, %s28_s17 }
  0x11   :  { %p234_p5 = scmp.ne.s32.totalorder %s28_s17, %s233_s18  ;;  %p239_p7 = scmp.lt.s32.totalorder %s233_s18, %s233_s18 }
  0x13   :  { %p240_p8 = por %p239_p7, %p238_p6 }
  0x15   :  { %p241_p9 = pnand %p240_p8, %p234_p5 }
  0x17   :  { %244 = shalt.err (!%p241_p9)
}
  0x18   :  { %33 = dma.hbm_to_vmem [thread:$0]  %s312_s1, 1024, %s28_s17, [#allocation7], %s272_s12, %s272_s12, %s273_s13  }
  0x19   :  { %265 = dma.done.wait [#allocation4], 256  }
  0x1a   :  { %266 = vsyncadd [#allocation4], 4294967040 }
  0x1b   :  { %267 = dma.done.wait [#allocation7], 1024  }
  0x1c   :  { %268 = vsyncadd [#allocation7], 4294966272  ;;  %v57_v0 = vld [vmem:[#allocation6 + $0x38] sm:$0xff]  ;;  %v56_v1 = vld [vmem:[#allocation6 + $0x30] sm:$0xff]  ;;  %vm58_vm0 = vcmask 523264   ;;  %s275_s0 = smov [#allocation8]  }
  0x1d   :  { %181 = vmatprep.subr.mxu0 %v57_v0  ;;  %v55_v2 = vld [vmem:[#allocation6 + $0x28] sm:$0xff]  ;;  %v48_v3 = vld [vmem:[#allocation3] sm:$0xff]  ;;  %v54_v4 = vld [vmem:[#allocation6 + $0x20] sm:$0xff]  ;;  %s156_s1 = sshll.u32 %s275_s0, 4  ;;  %s157_s1 = int_to_ptr.vmem [resolvable:$true] %s156_s1 }
  0x1e   :  { %182 = vmatpush3.msra.mxu0 %v57_v0  ;;  %197 = vmatprep.mubr.msk.f32.mxu0 %vm58_vm0, %v48_v3  ;;  %v53_v5 = vld [vmem:[#allocation6 + $0x18] sm:$0xff]  ;;  %v52_v6 = vld [vmem:[#allocation6 + $0x10] sm:$0xff]  ;;  %v51_v7 = vld [vmem:[#allocation6 + $0x8] sm:$0xff]  ;;  %s245_s21 = scalar_lea.vmem %s157_s1, 256  ;;  %p250_p11 = scmp.lt.s32.totalorder %s157_s1, %s157_s1 }
  0x1f   :  { %183 = vmatprep.subr.mxu0 %v56_v1  ;;  %v50_v8 = vld [vmem:[#allocation6] sm:$0xff]  ;;  %v49_v9 = vld [vmem:[#allocation3 + $0x8] sm:$0xff]  ;;  %p246_p10 = scmp.ne.s32.totalorder %s157_s1, %s245_s21  ;;  %p251_p12 = scmp.lt.s32.totalorder %s245_s21, %s245_s21 }
  0x20   :  { %184 = vmatpush3.msra.mxu0 %v56_v1 }
  0x21   :  { %185 = vmatprep.subr.mxu0 %v55_v2  ;;  %p252_p13 = por %p251_p12, %p250_p11 }
  0x22   :  { %186 = vmatpush3.msra.mxu0 %v55_v2 }
  0x23   :  { %187 = vmatprep.subr.mxu0 %v54_v4  ;;  %p253_p0 = pnand %p252_p13, %p246_p10 }
  0x24   :  { %188 = vmatpush3.msra.mxu0 %v54_v4 }
  0x25   :  { %189 = vmatprep.subr.mxu0 %v53_v5 }
  0x26   :  { %190 = vmatpush3.msra.mxu0 %v53_v5 }
  0x27   :  { %191 = vmatprep.subr.mxu0 %v52_v6 }
  0x28   :  { %192 = vmatpush3.msra.mxu0 %v52_v6 }
  0x29   :  { %193 = vmatprep.subr.mxu0 %v51_v7 }
  0x2a   :  { %194 = vmatpush3.msra.mxu0 %v51_v7 }
  0x2b   :  { %195 = vmatprep.subr.mxu0 %v50_v8 }
  0x2c   :  { %196 = vmatpush3.msra.mxu0 %v50_v8 }
  0x2d   :  { %198 = vmatmul.mubr.msk.f32.vlgmr.msra.gmra.mxu0 %vm58_vm0, %v49_v9 }
  0xed   :  { %v199_v10 = vpop.f32.mrf.mxu0 }
  0xee   :  { %150 = vst [vmem:[#allocation8 + $0x8] sm:$0xff] %v199_v10 }
  0xef   :  { %v131_v11 = vpop.f32.mrf.mxu0 }
  0xf0   :  { %149 = vst [vmem:[#allocation8] sm:$0xff] %v131_v11 }
  0xf1   :  { %256 = shalt.err (!%p253_p0)
}
  0xf2   :  { %162 = dma.vmem_to_hbm [thread:$0]  %s157_s1, 256, %s313_s2, [#allocation5], %s272_s12, %s272_s12, %s273_s13  }
  0xf3   :  { %269 = dma.done.wait [#allocation5], 256  }
  0xf4   :  { %270 = vsyncadd [#allocation5], 4294967040 }
  0xf5   :  { %166 = vsyncpa [#allocation4], 1 }
  0xf6   :  { %167 = vsyncpa [#allocation7], 1 }
  0xf7   :  { %168 = vsyncpa [#allocation5], 1 }

</bundles_post_ra>
